<compile_context>
chip_gen: v7x
topology: tpu7x:2x2x1
jax: 0.10.0
libtpu: 0.0.40
codegen_flags: <defaults>
</compile_context>

<pallas_src>
import functools

import jax
import jax.numpy as jnp
from jax.experimental import pallas as pl
from jax.experimental.pallas import tpu as pltpu


def mlp2_kernel(x_ref, w1t_ref, b1_ref, w2t_ref, b2_ref, o_ref):
    # ---- layer 1: x @ W1t + b1, ReLU (accumulate in f32) -------------------
    # Cast to MXU operand dtype only at the matmul input (no-op for f32).
    x = x_ref[...].astype(w1t_ref.dtype)
    h = jnp.dot(x, w1t_ref[...], preferred_element_type=jnp.float32)
    h = jnp.maximum(h + b1_ref[...], 0.0)          # bias add + ReLU in f32

    # ---- dropout(p=0.25): identity in eval/inference mode ------------------
    # TODO(synk): training-mode dropout would use pltpu.prng_seed +
    # pltpu.stateful_bernoulli; inference semantics are the identity.

    # ---- layer 2: h @ W2t + b2 ---------------------------------------------
    out = jnp.dot(h.astype(w2t_ref.dtype), w2t_ref[...],
                  preferred_element_type=jnp.float32)
    o_ref[...] = (out + b2_ref[...]).astype(o_ref.dtype)


def mlp_2layer_forward(x, w1, b1, w2, b2, *, tile_n=2048, compute_dtype=None):
    """Fused 2-layer MLP forward.

    x: [N, F]; w1: [H, F]; b1: [H]; w2: [C, H]; b2: [C]  (nn.Linear layout).
    Returns [N, C] float32.  `compute_dtype=jnp.bfloat16` uses bf16 MXU
    operands (f32 accumulation / bias / ReLU); default f32 bit-matches the
    f32 reference.
    """
    N, F = x.shape
    H = w1.shape[0]
    C = w2.shape[0]
    cd = x.dtype if compute_dtype is None else compute_dtype

    LANE = 128
    # Sublane packing of the x tile depends on x's storage dtype
    # (f32 -> 8 rows, bf16 -> 16 rows per vreg).
    SUB = 32 // jnp.dtype(x.dtype).itemsize

    # ---- pad H to a lane-dense multiple of 128 (weights only, done once) ---
    Hp = max(LANE, pl.cdiv(H, LANE) * LANE)
    if Hp == H:
        w1t = w1.T.astype(cd)                                        # [F, H]
        b1_2d = b1.reshape(1, H).astype(jnp.float32)                 # [1, H]
        w2t = w2.T.astype(cd)                                        # [H, C]
    else:
        w1t = jnp.zeros((F, Hp), cd).at[:, :H].set(w1.T.astype(cd))
        b1_2d = jnp.zeros((1, Hp), jnp.float32).at[:, :H].set(
            b1.astype(jnp.float32))
        w2t = jnp.zeros((Hp, C), cd).at[:H, :].set(w2.T.astype(cd))
    b2_2d = b2.reshape(1, C).astype(jnp.float32)                     # [1, C]

    # ---- row tiling ---------------------------------------------------------
    # Multiple of the sublane pack; capped near N/2 so n_tiles >= 2 whenever N
    # allows (keeps both v7x TensorCores fed).  No wrapper-side pad of x:
    # Pallas masks the partial last block, and its rows are never stored.
    tn = min(tile_n, max(SUB, pl.cdiv(pl.cdiv(N, 2), SUB) * SUB))
    n_tiles = pl.cdiv(N, tn)

    out = pl.pallas_call(
        mlp2_kernel,
        out_shape=jax.ShapeDtypeStruct((N, C), jnp.float32),
        grid_spec=pltpu.PrefetchScalarGridSpec(
            num_scalar_prefetch=0,
            grid=(n_tiles,),
            in_specs=[
                pl.BlockSpec((tn, F), lambda i: (i, 0)),    # x row tile
                pl.BlockSpec((F, Hp), lambda i: (0, 0)),    # W1t (resident)
                pl.BlockSpec((1, Hp), lambda i: (0, 0)),    # b1  (resident)
                pl.BlockSpec((Hp, C), lambda i: (0, 0)),    # W2t (resident)
                pl.BlockSpec((1, C), lambda i: (0, 0)),     # b2  (resident)
            ],
            # Unpadded (tn, C) output block: last dim equals full array dim,
            # so only the C real lanes ever hit HBM (no post-kernel slice).
            out_specs=pl.BlockSpec((tn, C), lambda i: (i, 0)),
        ),
        compiler_params=pltpu.CompilerParams(
            dimension_semantics=("parallel",)),
    )(x, w1t, b1_2d, w2t, b2_2d)

    return out


def _ref_forward(x, w1, b1, w2, b2):
    return jnp.maximum(x @ w1.T + b1, 0.0) @ w2.T + b2


if __name__ == "__main__":
    # Small shapes consistent with the module: N nodes, num_features,
    # hidden_channels, num_classes.
    N, NUM_FEATURES, HIDDEN, NUM_CLASSES = 8, 32, 32, 16

    key = jax.random.PRNGKey(0)
    kx, kw1, kb1, kw2, kb2, kx2 = jax.random.split(key, 6)

    x = jax.random.normal(kx, (N, NUM_FEATURES), dtype=jnp.float32)
    # edge_index is unused by the forward pass; build a dummy one anyway.
    edge_index = jnp.zeros((2, 4), dtype=jnp.int32)

    # Deterministic parameter init (nn.Linear convention: W[out, in]).
    w1 = jax.random.normal(kw1, (HIDDEN, NUM_FEATURES), jnp.float32) * 0.1
    b1 = jax.random.normal(kb1, (HIDDEN,), jnp.float32) * 0.1
    w2 = jax.random.normal(kw2, (NUM_CLASSES, HIDDEN), jnp.float32) * 0.1
    b2 = jax.random.normal(kb2, (NUM_CLASSES,), jnp.float32) * 0.1

    fwd = jax.jit(functools.partial(mlp_2layer_forward))

    # --- tiny-shape check (single tile path, f32) ----------------------------
    out = jax.block_until_ready(fwd(x, w1, b1, w2, b2))
    ref = _ref_forward(x, w1, b1, w2, b2)
    assert out.shape == (N, NUM_CLASSES)
    assert jnp.allclose(out, ref, atol=1e-5, rtol=1e-5)

    # --- multi-tile check, N not a multiple of the row tile (partial block) --
    N2 = 300
    x2 = jax.random.normal(kx2, (N2, NUM_FEATURES), dtype=jnp.float32)
    out2 = jax.block_until_ready(fwd(x2, w1, b1, w2, b2))
    ref2 = _ref_forward(x2, w1, b1, w2, b2)
    assert out2.shape == (N2, NUM_CLASSES)
    assert jnp.allclose(out2, ref2, atol=1e-5, rtol=1e-5)

    # --- bf16 MXU-operand path (f32 accumulation), looser tolerance ----------
    fwd_bf16 = jax.jit(functools.partial(mlp_2layer_forward,
                                         compute_dtype=jnp.bfloat16))
    out3 = jax.block_until_ready(fwd_bf16(x2, w1, b1, w2, b2))
    assert out3.shape == (N2, NUM_CLASSES)
    assert jnp.allclose(out3, ref2, atol=3e-2, rtol=3e-2)

    print("KERNEL_OK")
</pallas_src>

<mosaic_0001>
module attributes {stable_mosaic.version = 11 : i64} {
  func.func @mlp2_kernel(%arg0: i32, %arg1: memref<8x32xf32, #tpu.memory_space<vmem>>, %arg2: memref<32x128xf32, #tpu.memory_space<vmem>>, %arg3: memref<1x128xf32, #tpu.memory_space<vmem>>, %arg4: memref<128x16xf32, #tpu.memory_space<vmem>>, %arg5: memref<1x16xf32, #tpu.memory_space<vmem>>, %arg6: memref<8x16xf32, #tpu.memory_space<vmem>>) attributes {dimension_semantics = [#tpu.dimension_semantics<parallel>], iteration_bounds = array<i64: 1>, scalar_prefetch = 0 : i64, scratch_operands = 0 : i64, tpu.core_type = #tpu.core_type<tc>, window_params = [{transform_indices = @transform_0, window_bounds = array<i64: 8, 32>}, {pipeline_mode = #tpu.pipeline_mode<synchronous>, transform_indices = @transform_1, window_bounds = array<i64: 32, 128>}, {pipeline_mode = #tpu.pipeline_mode<synchronous>, transform_indices = @transform_2, window_bounds = array<i64: 1, 128>}, {pipeline_mode = #tpu.pipeline_mode<synchronous>, transform_indices = @transform_3, window_bounds = array<i64: 128, 16>}, {pipeline_mode = #tpu.pipeline_mode<synchronous>, transform_indices = @transform_4, window_bounds = array<i64: 1, 16>}, {transform_indices = @transform_5, window_bounds = array<i64: 8, 16>}]} {
    %c0 = arith.constant 0 : index
    %c0_0 = arith.constant 0 : index
    %0 = vector.load %arg1[%c0, %c0_0] : memref<8x32xf32, #tpu.memory_space<vmem>>, vector<8x32xf32>
    %c0_1 = arith.constant 0 : index
    %c0_2 = arith.constant 0 : index
    %1 = vector.load %arg2[%c0_1, %c0_2] : memref<32x128xf32, #tpu.memory_space<vmem>>, vector<32x128xf32>
    %cst = arith.constant dense<0.000000e+00> : vector<8x128xf32>
    %2 = tpu.matmul %0, %1, %cst {dimension_numbers = #tpu.dot_dimension_numbers<[1], [0], [0], [1], [0, 0, 1, 1], [], []>} : vector<8x32xf32>, vector<32x128xf32>, vector<8x128xf32> -> vector<8x128xf32>
    %c0_3 = arith.constant 0 : index
    %c0_4 = arith.constant 0 : index
    %3 = vector.load %arg3[%c0_3, %c0_4] : memref<1x128xf32, #tpu.memory_space<vmem>>, vector<1x128xf32>
    %4 = vector.broadcast %3 : vector<1x128xf32> to vector<8x128xf32>
    %5 = arith.addf %2, %4 : vector<8x128xf32>
    %cst_5 = arith.constant 0.000000e+00 : f32
    %6 = vector.broadcast %cst_5 : f32 to vector<8x128xf32>
    %7 = arith.maximumf %5, %6 : vector<8x128xf32>
    %c0_6 = arith.constant 0 : index
    %c0_7 = arith.constant 0 : index
    %8 = vector.load %arg4[%c0_6, %c0_7] : memref<128x16xf32, #tpu.memory_space<vmem>>, vector<128x16xf32>
    %cst_8 = arith.constant dense<0.000000e+00> : vector<8x16xf32>
    %9 = tpu.matmul %7, %8, %cst_8 {dimension_numbers = #tpu.dot_dimension_numbers<[1], [0], [0], [1], [0, 0, 1, 1], [], []>} : vector<8x128xf32>, vector<128x16xf32>, vector<8x16xf32> -> vector<8x16xf32>
    %c0_9 = arith.constant 0 : index
    %c0_10 = arith.constant 0 : index
    %10 = vector.load %arg5[%c0_9, %c0_10] : memref<1x16xf32, #tpu.memory_space<vmem>>, vector<1x16xf32>
    %11 = vector.broadcast %10 : vector<1x16xf32> to vector<8x16xf32>
    %12 = arith.addf %9, %11 : vector<8x16xf32>
    %c0_11 = arith.constant 0 : index
    %c0_12 = arith.constant 0 : index
    %13 = vector.load %arg6[%c0_11, %c0_12] : memref<8x16xf32, #tpu.memory_space<vmem>>, vector<8x16xf32>
    tpu.vector_store %arg6[%c0_11, %c0_12], %12 {strides = array<i32>} : memref<8x16xf32, #tpu.memory_space<vmem>>, vector<8x16xf32>,
    return
  }
  func.func @transform_0(%arg0: i32) -> (i32, i32) {
    %c0_i32 = arith.constant 0 : i32
    %c0_i32_0 = arith.constant 0 : i32
    return %arg0, %c0_i32 : i32, i32
  }
  func.func @transform_1(%arg0: i32) -> (i32, i32) {
    %c0_i32 = arith.constant 0 : i32
    %c0_i32_0 = arith.constant 0 : i32
    %c0_i32_1 = arith.constant 0 : i32
    return %c0_i32, %c0_i32_0 : i32, i32
  }
  func.func @transform_2(%arg0: i32) -> (i32, i32) {
    %c0_i32 = arith.constant 0 : i32
    %c0_i32_0 = arith.constant 0 : i32
    %c0_i32_1 = arith.constant 0 : i32
    return %c0_i32, %c0_i32_0 : i32, i32
  }
  func.func @transform_3(%arg0: i32) -> (i32, i32) {
    %c0_i32 = arith.constant 0 : i32
    %c0_i32_0 = arith.constant 0 : i32
    %c0_i32_1 = arith.constant 0 : i32
    return %c0_i32, %c0_i32_0 : i32, i32
  }
  func.func @transform_4(%arg0: i32) -> (i32, i32) {
    %c0_i32 = arith.constant 0 : i32
    %c0_i32_0 = arith.constant 0 : i32
    %c0_i32_1 = arith.constant 0 : i32
    return %c0_i32, %c0_i32_0 : i32, i32
  }
  func.func @transform_5(%arg0: i32) -> (i32, i32) {
    %c0_i32 = arith.constant 0 : i32
    %c0_i32_0 = arith.constant 0 : i32
    return %arg0, %c0_i32 : i32, i32
  }
}

</mosaic_0001>

<bundles_post_ra>
// kernel: mlp_2layer_forward.1
= control target key start
LH: loop header
LB: loop body
LE: loop exit
PB: predicated region body
PF: predicated region fallthrough
CT: control target
= control target key end

     0   :  { %v346_v3 = vmov 0.0|0.0   ;;  %vm347_vm0 = vmmov 0   ;;  %v348_v6 = vmov 0.0   ;;  %s461_s0 = inlined_call_operand.vmem [shape: f32[8,32], index: 0, kind: input, shape index: {}]   ;;  %s462_s1 = inlined_call_operand.vmem [shape: f32[32,128], index: 1, kind: input, shape index: {}]   ;;  %s463_s2 = inlined_call_operand.vmem [shape: f32[1,128], index: 2, kind: input, shape index: {}]   ;;  %s464_s3 = inlined_call_operand.vmem [shape: f32[128,16], index: 3, kind: input, shape index: {}]   ;;  %s465_s4 = inlined_call_operand.vmem [shape: f32[1,16], index: 4, kind: input, shape index: {}]   ;;  %s466_s5 = inlined_call_operand.hbm [shape: f32[8,16], index: 5, kind: output, shape index: {}]  }
   0x1   :  { %v22_v0 = vld [vmem:[%s462_s1] sm:$0xff]  ;;  %v23_v1 = vld [vmem:[%s462_s1 + $0x8] sm:$0xff]  ;;  %v24_v2 = vld [vmem:[%s462_s1 + $0x10] sm:$0xff]  ;;  %288 = vmatprep.subr.bf16.mxu0 %v346_v3  ;;  %250 = vmatprep.mubr.msk.f32.mxu0 %vm347_vm0, %v348_v6 }
   0x2   :  { %v289_v4 = vpack.c.bf16 %v23_v1, %v22_v0  ;;  %v25_v5 = vld [vmem:[%s462_s1 + $0x18] sm:$0xff]  ;;  %v108_v7 = vld [vmem:[%s464_s3] sm:$0xff]  ;;  %294 = vmatprep.subr.bf16.mxu1 %v346_v3  ;;  %v109_v8 = vld [vmem:[%s464_s3 + $0x8] sm:$0xff]  ;;  %285 = vmatprep.mubr.msk.f32.mxu1 %vm347_vm0, %v348_v6 }
   0x3   :  { %v110_v9 = vld [vmem:[%s464_s3 + $0x10] sm:$0xff]  ;;  %v111_v10 = vld [vmem:[%s464_s3 + $0x18] sm:$0xff]  ;;  %v292_v11 = vpack.c.bf16 %v25_v5, %v24_v2  ;;  %v295_v12 = vpack.c.bf16 %v109_v8, %v108_v7  ;;  %v112_v14 = vld [vmem:[%s464_s3 + $0x20] sm:$0xff] }
   0x4   :  { %290 = vmatpush3.bf16.msra.mxu0 %v289_v4  ;;  %v298_v13 = vpack.c.bf16 %v111_v10, %v110_v9  ;;  %v113_v15 = vld [vmem:[%s464_s3 + $0x28] sm:$0xff] }
   0x5   :  { %291 = vmatprep.subr.bf16.mxu0 %v346_v3  ;;  %296 = vmatpush3.bf16.msra.mxu1 %v295_v12 }
   0x6   :  { %297 = vmatprep.subr.bf16.mxu1 %v346_v3 }
   0x7   :  { %10 = vsyncpa [#allocation3], 0  ;;  %v21_v16 = vld [vmem:[%s461_s0] sm:$0xff]  ;;  %vm33_vm1 = vcmask 261120   ;;  %v301_v17 = vpack.c.bf16 %v113_v15, %v112_v14  ;;  %v114_v18 = vld [vmem:[%s464_s3 + $0x30] sm:$0xff]  ;;  %s349_s11 = smov [#allocation2]  }
   0x8   :  { %293 = vmatpush3.bf16.msra.mxu0 %v292_v11  ;;  %v115_v19 = vld [vmem:[%s464_s3 + $0x38] sm:$0xff]  ;;  %v116_v21 = vld [vmem:[%s464_s3 + $0x40] sm:$0xff]  ;;  %v117_v22 = vld [vmem:[%s464_s3 + $0x48] sm:$0xff]  ;;  %s209_s12 = sshll.u32 %s349_s11, 4  ;;  %vm201_vm2 = vcmask 130048   ;;  %s210_s12 = int_to_ptr.vmem [resolvable:$true] %s209_s12 }
   0x9   :  { %299 = vmatpush3.bf16.msra.mxu1 %v298_v13  ;;  %v304_v20 = vpack.c.bf16 %v115_v19, %v114_v18  ;;  %v307_v23 = vpack.c.bf16 %v117_v22, %v116_v21  ;;  %v118_v24 = vld [vmem:[%s464_s3 + $0x50] sm:$0xff]  ;;  %v119_v25 = vld [vmem:[%s464_s3 + $0x58] sm:$0xff]  ;;  %v120_v27 = vld [vmem:[%s464_s3 + $0x60] sm:$0xff]  ;;  %p327_p1 = scmp.lt.s32.totalorder %s210_s12, %s210_s12 }
   0xa   :  { %300 = vmatprep.subr.bf16.mxu1 %v346_v3  ;;  %v310_v26 = vpack.c.bf16 %v119_v25, %v118_v24  ;;  %v121_v28 = vld [vmem:[%s464_s3 + $0x68] sm:$0xff]  ;;  %v122_v30 = vld [vmem:[%s464_s3 + $0x70] sm:$0xff]  ;;  %v123_v31 = vld [vmem:[%s464_s3 + $0x78] sm:$0xff]  ;;  %s322_s3 = scalar_lea.vmem %s210_s12, 128 }
   0xb   :  { %251 = vmatmul.mubr.msk.f32.vlgmr.msra.gmra.mrb[0].mxu0 %vm33_vm1, %v21_v16  ;;  %v313_v29 = vpack.c.bf16 %v121_v28, %v120_v27  ;;  %v316_v32 = vpack.c.bf16 %v123_v31, %v122_v30  ;;  %v217_v33 = vld [vmem:[%s463_s2] ss:$0 sm:$0xff]  ;;  %p323_p0 = scmp.ne.s32.totalorder %s210_s12, %s322_s3  ;;  %p328_p2 = scmp.lt.s32.totalorder %s322_s3, %s322_s3 }
   0xc   :  { %v219_v38 = vld [vmem:[%s465_s4] ss:$0 sm:$0xff] }
   0xd   :  { %302 = vmatpush3.bf16.msra.mxu1 %v301_v17  ;;  %p329_p3 = por %p328_p2, %p327_p1 }
   0xe   :  { %303 = vmatprep.subr.bf16.mxu1 %v346_v3 }
   0xf   :  { %p330_p4 = pnand %p329_p3, %p323_p0 }
  0x11   :  { %305 = vmatpush3.bf16.msra.mxu1 %v304_v20 }
  0x12   :  { %306 = vmatprep.subr.bf16.mxu1 %v346_v3 }
  0x15   :  { %308 = vmatpush3.bf16.msra.mxu1 %v307_v23 }
  0x16   :  { %309 = vmatprep.subr.bf16.mxu1 %v346_v3 }
  0x19   :  { %311 = vmatpush3.bf16.msra.mxu1 %v310_v26 }
  0x1a   :  { %312 = vmatprep.subr.bf16.mxu1 %v346_v3 }
  0x1d   :  { %314 = vmatpush3.bf16.msra.mxu1 %v313_v29 }
  0x1e   :  { %315 = vmatprep.subr.bf16.mxu1 %v346_v3 }
  0x21   :  { %317 = vmatpush3.bf16.msra.mxu1 %v316_v32 }
  0xde   :  { %v103_v34 = vpop.f32.mrb[0].mxu0 }
  0xdf   :  { %v104_v35 = vadd.f32 %v217_v33, %v103_v34  ;;  %v252_v36 = vpop.f32.mrb[1].mxu0 }
  0xe1   :  { %v107_v37 = vmax.f32 %v104_v35, 0.0 }
  0xe3   :  { %286 = vmatmul.mubr.f32.vlgmr.msra.gmra.mrb[0].mxu1 %v107_v37 }
 0x1b6   :  { %v197_v39 = vpop.f32.mrb[0].mxu1 }
 0x1b7   :  { %v198_v40 = vadd.f32 %v219_v38, %v197_v39  ;;  %v287_v41 = vpop.f32.mrb[1].mxu1 }
 0x1b9   :  { %202 = vst.msk [vmem:[#allocation2] sm:$0xff] %vm201_vm2, %v198_v40 }
 0x1ba   :  { %333 = shalt.err (!%p330_p4)
}
 0x1bb   :  { %s334_s14 = scalar_lea.hbm %s466_s5, 128 }
 0x1bc   :  { %p335_p5 = scmp.ne.s32.totalorder %s466_s5, %s334_s14  ;;  %p338_p6 = scmp.lt.u32.totalorder %s334_s14, %s466_s5 }
 0x1be   :  { %p340_p7 = pnand %p338_p6, %p335_p5 }
 0x1c0   :  { %343 = shalt.err (!%p340_p7)
}
 0x1c1   :  { %212 = dma.vmem_to_hbm [thread:$0]  %s210_s12, 128, %s466_s5, [#allocation3]  }
 0x1c2   :  { %344 = dma.done.wait [#allocation3], 128  }
 0x1c3   :  { %345 = vsyncadd [#allocation3], 4294967168 }
 0x1c4   :  { %216 = vsyncpa [#allocation3], 1 }

</bundles_post_ra>
